<compile_context>
chip_gen: v5e
topology: v5e:2x2
jax: 0.10.0
libtpu: 0.0.40
codegen_flags: <defaults>
</compile_context>

<pallas_src>
import math

import jax
import jax.numpy as jnp
from jax.experimental import pallas as pl
from jax.experimental.pallas import tpu as pltpu


# ----------------------------------------------------------------------------
# Pallas kernel factory: fused MLP (hidden ReLU stack + sigmoid reconstruction)
# ----------------------------------------------------------------------------
def make_decoder_x_kernel(n_hidden):
    """Kernel refs: (x, w_0, b_0, ..., w_{n-1}, b_{n-1}, w_rec, b_rec, out)."""

    def kernel(x_ref, *refs):
        out_ref = refs[-1]
        h = x_ref[...]                                    # bf16 row tile
        # Hidden stack: relu(h @ W + b); dropout is identity in eval mode.
        for i in range(n_hidden):
            w = refs[2 * i][...]                          # bf16 weights
            b = refs[2 * i + 1][...]                      # f32 bias
            acc = jnp.dot(h, w, preferred_element_type=jnp.float32) + b
            # ReLU in f32, then cast back to bf16 for the next MXU pass.
            h = jnp.maximum(acc, 0.0).astype(jnp.bfloat16)
        # Reconstruction head + sigmoid output activation.
        wr = refs[2 * n_hidden][...]
        br = refs[2 * n_hidden + 1][...]
        logits = jnp.dot(h, wr, preferred_element_type=jnp.float32) + br
        # sigmoid(x) = 1 / (1 + exp(-x)): exp on EUP, approx reciprocal on EUP
        # (keeps the epilogue out of the VALU divide path).
        sig = pl.reciprocal(1.0 + jnp.exp(-logits), approx=True)
        out_ref[...] = sig.astype(out_ref.dtype)

    return kernel


# ----------------------------------------------------------------------------
# Wrapper: row-tiled grid over the batch dimension
# ----------------------------------------------------------------------------
def _choose_row_tile(B, tm_max=1024):
    """Largest sensible row tile, keeping >= 2 grid steps (v7x has 2 TCs)."""
    tm = min(tm_max, max(16, B // 2))
    tm = max(16, (tm // 16) * 16)     # multiple of 16: safe for bf16 sublane packing
    return tm


def decoder_x_forward(x, weights, biases, *, tm=None, out_dtype=jnp.float32):
    """weights/biases: lists, hidden layers first then the reconstruction layer."""
    B, z_dim = x.shape
    n_hidden = len(weights) - 1
    x_dim = weights[-1].shape[1]
    out_bytes = jnp.dtype(out_dtype).itemsize

    if tm is None:
        tm = _choose_row_tile(B)
    tm = max(16, (tm // 16) * 16)

    # Pad batch to a tile multiple; padded rows are sliced off after the call.
    grid_m = pl.cdiv(B, tm)
    B_pad = grid_m * tm
    x_in = x.astype(jnp.bfloat16)
    if B_pad != B:
        x_in = jnp.pad(x_in, ((0, B_pad - B), (0, 0)))

    # Row-tiled input / output; full (grid-invariant) blocks for weights & biases.
    in_specs = [pl.BlockSpec((tm, z_dim), lambda i: (i, 0))]
    inputs = [x_in]
    for w, b in zip(weights, biases):
        in_specs.append(pl.BlockSpec(w.shape, lambda i: (0, 0)))
        inputs.append(w.astype(jnp.bfloat16))
        in_specs.append(pl.BlockSpec((1, b.shape[-1]), lambda i: (0, 0)))
        inputs.append(b.reshape(1, -1).astype(jnp.float32))
    out_spec = pl.BlockSpec((tm, x_dim), lambda i: (i, 0))

    # Advisory cost estimate for the XLA scheduler.
    flops = 0
    f_in = z_dim
    for w in weights:
        flops += 2 * B_pad * f_in * w.shape[1]
        f_in = w.shape[1]
    bytes_accessed = (x_in.size * 2
                      + sum(w.size for w in weights) * 2
                      + sum(b.size for b in biases) * 4
                      + B_pad * x_dim * out_bytes)
    cost = pl.CostEstimate(flops=flops,
                           transcendentals=2 * B_pad * x_dim,   # exp + reciprocal
                           bytes_accessed=bytes_accessed)

    # VMEM budget from actual buffer math (double-buffered tiles + weights)
    # plus headroom; never request the entire 64 MiB of a v7x TensorCore.
    per_step = (2 * (tm * z_dim * 2 + tm * x_dim * out_bytes)
                + 2 * sum(w.size * 2 for w in weights)
                + 2 * sum(b.size * 4 for b in biases))
    vmem_limit = int(min(32 << 20, max(8 << 20, 2 * per_step)))

    out = pl.pallas_call(
        make_decoder_x_kernel(n_hidden),
        out_shape=jax.ShapeDtypeStruct((B_pad, x_dim), out_dtype),
        grid=(grid_m,),
        in_specs=in_specs,
        out_specs=out_spec,
        compiler_params=pltpu.CompilerParams(
            dimension_semantics=("parallel",),
            vmem_limit_bytes=vmem_limit),
        cost_estimate=cost,
    )(*inputs)

    return out[:B] if B_pad != B else out


# ----------------------------------------------------------------------------
# Pure-JAX reference (same math, f32) for correctness checking.
# ----------------------------------------------------------------------------
def decoder_x_reference(x, weights, biases):
    h = x.astype(jnp.float32)
    for w, b in zip(weights[:-1], biases[:-1]):
        h = jnp.maximum(h @ w + b.reshape(1, -1), 0.0)   # dropout = identity (eval)
    return jax.nn.sigmoid(h @ weights[-1] + biases[-1].reshape(1, -1))


def xavier_normal(key, shape):
    fan_in, fan_out = shape
    std = math.sqrt(2.0 / (fan_in + fan_out))
    return std * jax.random.normal(key, shape, dtype=jnp.float32)


if __name__ == "__main__":
    # dims = [z_dim, h_dim, x_dim]  (as in Decoder_X.__init__)
    B = 256            # batch of latent codes
    Z_DIM = 16
    H_DIM = [64, 32]
    X_DIM = 128        # lane-dense output width

    key = jax.random.PRNGKey(0)
    kx, k0, k1, k2 = jax.random.split(key, 4)

    x = jax.random.normal(kx, (B, Z_DIM), dtype=jnp.float32)

    layer_dims = [Z_DIM, *H_DIM, X_DIM]
    wkeys = [k0, k1, k2]
    weights, biases = [], []
    for i in range(1, len(layer_dims)):
        weights.append(xavier_normal(wkeys[i - 1], (layer_dims[i - 1], layer_dims[i])))
        biases.append(jnp.zeros((layer_dims[i],), jnp.float32))

    # Main check (divisible batch; tm auto-picked -> 2 grid steps here).
    out = decoder_x_forward(x, weights, biases)
    out = jax.block_until_ready(out)
    ref = decoder_x_reference(x, weights, biases)

    assert out.shape == (B, X_DIM)
    assert bool(jnp.all(jnp.isfinite(out)))
    # bf16 MXU operands + approx reciprocal -> looser tolerance than the f32 path.
    assert jnp.allclose(out, ref, atol=2e-2, rtol=2e-2), \
        float(jnp.max(jnp.abs(out - ref)))

    # Exercise the non-divisible-batch (cdiv + padding) path.
    B2 = 200
    x2 = x[:B2]
    out2 = jax.block_until_ready(decoder_x_forward(x2, weights, biases))
    ref2 = decoder_x_reference(x2, weights, biases)
    assert out2.shape == (B2, X_DIM)
    assert jnp.allclose(out2, ref2, atol=2e-2, rtol=2e-2), \
        float(jnp.max(jnp.abs(out2 - ref2)))

    print("KERNEL_OK")
</pallas_src>

<mosaic_0001>
module attributes {stable_mosaic.version = 11 : i64} {
  func.func @kernel(%arg0: i32, %arg1: memref<128x16xbf16, #tpu.memory_space<vmem>>, %arg2: memref<16x64xbf16, #tpu.memory_space<vmem>>, %arg3: memref<1x64xf32, #tpu.memory_space<vmem>>, %arg4: memref<64x32xbf16, #tpu.memory_space<vmem>>, %arg5: memref<1x32xf32, #tpu.memory_space<vmem>>, %arg6: memref<32x128xbf16, #tpu.memory_space<vmem>>, %arg7: memref<1x128xf32, #tpu.memory_space<vmem>>, %arg8: memref<128x128xf32, #tpu.memory_space<vmem>>) attributes {dimension_semantics = [#tpu.dimension_semantics<parallel>], iteration_bounds = array<i64: 2>, scalar_prefetch = 0 : i64, scratch_operands = 0 : i64, tpu.core_type = #tpu.core_type<tc>, window_params = [{transform_indices = @transform_0, window_bounds = array<i64: 128, 16>}, {pipeline_mode = #tpu.pipeline_mode<synchronous>, transform_indices = @transform_1, window_bounds = array<i64: 16, 64>}, {pipeline_mode = #tpu.pipeline_mode<synchronous>, transform_indices = @transform_2, window_bounds = array<i64: 1, 64>}, {pipeline_mode = #tpu.pipeline_mode<synchronous>, transform_indices = @transform_3, window_bounds = array<i64: 64, 32>}, {pipeline_mode = #tpu.pipeline_mode<synchronous>, transform_indices = @transform_4, window_bounds = array<i64: 1, 32>}, {pipeline_mode = #tpu.pipeline_mode<synchronous>, transform_indices = @transform_5, window_bounds = array<i64: 32, 128>}, {pipeline_mode = #tpu.pipeline_mode<synchronous>, transform_indices = @transform_6, window_bounds = array<i64: 1, 128>}, {transform_indices = @transform_7, window_bounds = array<i64: 128, 128>}]} {
    %c0 = arith.constant 0 : index
    %c0_0 = arith.constant 0 : index
    %0 = vector.load %arg1[%c0, %c0_0] : memref<128x16xbf16, #tpu.memory_space<vmem>>, vector<128x16xbf16>
    %c0_1 = arith.constant 0 : index
    %c0_2 = arith.constant 0 : index
    %1 = vector.load %arg2[%c0_1, %c0_2] : memref<16x64xbf16, #tpu.memory_space<vmem>>, vector<16x64xbf16>
    %c0_3 = arith.constant 0 : index
    %c0_4 = arith.constant 0 : index
    %2 = vector.load %arg3[%c0_3, %c0_4] : memref<1x64xf32, #tpu.memory_space<vmem>>, vector<1x64xf32>
    %cst = arith.constant dense<0.000000e+00> : vector<128x64xf32>
    %3 = tpu.matmul %0, %1, %cst {dimension_numbers = #tpu.dot_dimension_numbers<[1], [0], [0], [1], [0, 0, 1, 1], [], []>} : vector<128x16xbf16>, vector<16x64xbf16>, vector<128x64xf32> -> vector<128x64xf32>
    %4 = vector.broadcast %2 : vector<1x64xf32> to vector<128x64xf32>
    %5 = arith.addf %3, %4 : vector<128x64xf32>
    %cst_5 = arith.constant 0.000000e+00 : f32
    %6 = vector.broadcast %cst_5 : f32 to vector<128x64xf32>
    %7 = arith.maximumf %5, %6 : vector<128x64xf32>
    %8 = arith.truncf %7 : vector<128x64xf32> to vector<128x64xbf16>
    %c0_6 = arith.constant 0 : index
    %c0_7 = arith.constant 0 : index
    %9 = vector.load %arg4[%c0_6, %c0_7] : memref<64x32xbf16, #tpu.memory_space<vmem>>, vector<64x32xbf16>
    %c0_8 = arith.constant 0 : index
    %c0_9 = arith.constant 0 : index
    %10 = vector.load %arg5[%c0_8, %c0_9] : memref<1x32xf32, #tpu.memory_space<vmem>>, vector<1x32xf32>
    %cst_10 = arith.constant dense<0.000000e+00> : vector<128x32xf32>
    %11 = tpu.matmul %8, %9, %cst_10 {dimension_numbers = #tpu.dot_dimension_numbers<[1], [0], [0], [1], [0, 0, 1, 1], [], []>} : vector<128x64xbf16>, vector<64x32xbf16>, vector<128x32xf32> -> vector<128x32xf32>
    %12 = vector.broadcast %10 : vector<1x32xf32> to vector<128x32xf32>
    %13 = arith.addf %11, %12 : vector<128x32xf32>
    %cst_11 = arith.constant 0.000000e+00 : f32
    %14 = vector.broadcast %cst_11 : f32 to vector<128x32xf32>
    %15 = arith.maximumf %13, %14 : vector<128x32xf32>
    %16 = arith.truncf %15 : vector<128x32xf32> to vector<128x32xbf16>
    %c0_12 = arith.constant 0 : index
    %c0_13 = arith.constant 0 : index
    %17 = vector.load %arg6[%c0_12, %c0_13] : memref<32x128xbf16, #tpu.memory_space<vmem>>, vector<32x128xbf16>
    %c0_14 = arith.constant 0 : index
    %c0_15 = arith.constant 0 : index
    %18 = vector.load %arg7[%c0_14, %c0_15] : memref<1x128xf32, #tpu.memory_space<vmem>>, vector<1x128xf32>
    %cst_16 = arith.constant dense<0.000000e+00> : vector<128x128xf32>
    %19 = tpu.matmul %16, %17, %cst_16 {dimension_numbers = #tpu.dot_dimension_numbers<[1], [0], [0], [1], [0, 0, 1, 1], [], []>} : vector<128x32xbf16>, vector<32x128xbf16>, vector<128x128xf32> -> vector<128x128xf32>
    %20 = vector.broadcast %18 : vector<1x128xf32> to vector<128x128xf32>
    %21 = arith.addf %19, %20 : vector<128x128xf32>
    %cst_17 = arith.constant 0.000000e+00 : f32
    %22 = vector.broadcast %cst_17 : f32 to vector<128x128xf32>
    %23 = arith.subf %22, %21 : vector<128x128xf32>
    %24 = math.exp %23 : vector<128x128xf32>
    %cst_18 = arith.constant 1.000000e+00 : f32
    %25 = vector.broadcast %cst_18 : f32 to vector<128x128xf32>
    %26 = arith.addf %25, %24 : vector<128x128xf32>
    %27 = tpu.reciprocal %26 {approx = true} : vector<128x128xf32> -> vector<128x128xf32>
    %c0_19 = arith.constant 0 : index
    %c0_20 = arith.constant 0 : index
    %28 = vector.load %arg8[%c0_19, %c0_20] : memref<128x128xf32, #tpu.memory_space<vmem>>, vector<128x128xf32>
    tpu.vector_store %arg8[%c0_19, %c0_20], %27 {strides = array<i32>} : memref<128x128xf32, #tpu.memory_space<vmem>>, vector<128x128xf32>,
    return
  }
  func.func @transform_0(%arg0: i32) -> (i32, i32) {
    %c0_i32 = arith.constant 0 : i32
    %c0_i32_0 = arith.constant 0 : i32
    return %arg0, %c0_i32 : i32, i32
  }
  func.func @transform_1(%arg0: i32) -> (i32, i32) {
    %c0_i32 = arith.constant 0 : i32
    %c0_i32_0 = arith.constant 0 : i32
    %c0_i32_1 = arith.constant 0 : i32
    return %c0_i32, %c0_i32_0 : i32, i32
  }
  func.func @transform_2(%arg0: i32) -> (i32, i32) {
    %c0_i32 = arith.constant 0 : i32
    %c0_i32_0 = arith.constant 0 : i32
    %c0_i32_1 = arith.constant 0 : i32
    return %c0_i32, %c0_i32_0 : i32, i32
  }
  func.func @transform_3(%arg0: i32) -> (i32, i32) {
    %c0_i32 = arith.constant 0 : i32
    %c0_i32_0 = arith.constant 0 : i32
    %c0_i32_1 = arith.constant 0 : i32
    return %c0_i32, %c0_i32_0 : i32, i32
  }
  func.func @transform_4(%arg0: i32) -> (i32, i32) {
    %c0_i32 = arith.constant 0 : i32
    %c0_i32_0 = arith.constant 0 : i32
    %c0_i32_1 = arith.constant 0 : i32
    return %c0_i32, %c0_i32_0 : i32, i32
  }
  func.func @transform_5(%arg0: i32) -> (i32, i32) {
    %c0_i32 = arith.constant 0 : i32
    %c0_i32_0 = arith.constant 0 : i32
    %c0_i32_1 = arith.constant 0 : i32
    return %c0_i32, %c0_i32_0 : i32, i32
  }
  func.func @transform_6(%arg0: i32) -> (i32, i32) {
    %c0_i32 = arith.constant 0 : i32
    %c0_i32_0 = arith.constant 0 : i32
    %c0_i32_1 = arith.constant 0 : i32
    return %c0_i32, %c0_i32_0 : i32, i32
  }
  func.func @transform_7(%arg0: i32) -> (i32, i32) {
    %c0_i32 = arith.constant 0 : i32
    %c0_i32_0 = arith.constant 0 : i32
    return %arg0, %c0_i32 : i32, i32
  }
}

</mosaic_0001>

<bundles_post_ra>
// kernel: tpu_custom_call.1
= control target key start
LH: loop header
LB: loop body
LE: loop exit
PB: predicated region body
PF: predicated region fallthrough
CT: control target
= control target key end

     0   :  { %12 = vsyncpa [#allocation3], 0  ;;  %s1379_s0 = inlined_call_operand.vmem [shape: bf16[256,16], index: 0, kind: input, shape index: {}]   ;;  %s1380_s1 = inlined_call_operand.vmem [shape: bf16[16,64], index: 1, kind: input, shape index: {}]   ;;  %s1381_s2 = inlined_call_operand.vmem [shape: f32[1,64], index: 2, kind: input, shape index: {}]   ;;  %s1382_s3 = inlined_call_operand.vmem [shape: bf16[64,32], index: 3, kind: input, shape index: {}]   ;;  %s1383_s4 = inlined_call_operand.vmem [shape: f32[1,32], index: 4, kind: input, shape index: {}]   ;;  %s1384_s5 = inlined_call_operand.vmem [shape: bf16[32,128], index: 5, kind: input, shape index: {}]   ;;  %s1385_s6 = inlined_call_operand.vmem [shape: f32[1,128], index: 6, kind: input, shape index: {}]   ;;  %s1386_s7 = inlined_call_operand.hbm [shape: f32[256,128], index: 7, kind: output, shape index: {}]  }
   0x1   :  { %14 = vsyncpa [#allocation3 + $0x1], 0  ;;  %s1182_s24 = smov 0   ;;  %s1184_s25 = smov 0  }
   0x2   :  { %s1186_s26 = smov 0   ;;  %s1188_s27 = smov 0  }
   0x3 LB: > { %s1203_s28 = sadd.s32 4294967295, %s1138_s27   ;;  %s849_s29 = sadd.s32 4294967294, %s1138_s27   ;;  %s1138_s27 = sphi %s1188_s27, %s1392_s27   ;;  %s1134_s26 = sphi %s1186_s26, %s1391_s26   ;;  %s1130_s25 = sphi %s1184_s25, %s1390_s25   ;;  %s1126_s24 = sphi %s1182_s24, %s1389_s24  }
   0x4   : > { %s1207_s30 = sadd.s32 1, %s1138_s27   ;;  %s179_s8 = sadd.s32 1, %s1134_s26 }
   0x5   : > { %s176_s9 = ssub.s32 %s1138_s27, %s1207_s30  ;;  %p189_p0 = scmp.ne.s32.totalorder %s1134_s26, %s1130_s25 }
   0x6   : > { %p177_p1 = scmp.eq.s32.totalorder %s176_s9, 0  ;;  %p190_p2 = scmp.eq.s32.totalorder %s1203_s28, 1 }
   0x7   : > { %p195_p3 = scmp.ne.s32.totalorder %s1130_s25, %s1126_s24  ;;  %p196_p4 = scmp.eq.s32.totalorder %s849_s29, 1 }
   0x8   : > { %s1218_s10 = scalar_select %p177_p1, %s1134_s26, %s179_s8  }
   0x9   : > { %p1220_p5 = por %p190_p2, %p189_p0  ;;  %p1224_p6 = por %p196_p4, %p195_p3 }
   0xa   : > { %p852_p7 = scmp.ge.s32.totalorder %s1138_s27, 1  ;;  %p241_p8 = scmp.lt.s32.totalorder %s1138_s27, 3 }
   0xc   : > { %p242_p9 = pnand %p852_p7, %p241_p8 }
   0xd   : > { %s854_s15 = sshll.u32 (!%p242_p9), %s1203_s28, 4  ;;  %s270_s29 = sand.u32 (!%p242_p9), 1, %s1130_s25  }
   0xe   : > { %245 = sbr.rel (%p242_p9) target bundleno = 587 (0x24b), region = 48  ;;  %p274_p10 = scmp.lt.s32.totalorder (!%p242_p9), %s854_s15, 31 }
   0xf   : > { %s853_s8 = sshll.u32 (!%p242_p9), %s270_s29, 7  ;;  %s960_s13 = sshll.u32 (!%p242_p9), %s1203_s28, 7 }
  0x10   : > { %s1314_s9 = scalar_lea.vmem (!%p242_p9), [#allocation2], %s853_s8  ;;  %s1096_s23 = scalar_lea.hbm (!%p242_p9), %s1386_s7, 256 }
  0x11   : > { %s784_s17 = sshll.u32 (!%p242_p9), %s1314_s9, 4  ;;  %s785_s17 = int_to_ptr.vmem [resolvable:$true] %s784_s17 }
  0x13   : > { %v953_v0 = vld [vmem:[%s1380_s1] sm:$0xff]  ;;  %s1394_s15 = smov (!%p274_p10, %s854_s15), 31  ;;  %vm349_vm0 = vcmask 130048   ;;  %v957_v8 = vld [vmem:[%s1382_s3 + $0x18] sm:$0xff]  ;;  %v956_v10 = vld [vmem:[%s1382_s3 + $0x10] sm:$0xff]  ;;  %vm483_vm1 = vcmask 523264  }
  0x14   : > { %381 = vmatpush.bf16.msra.mxu0 %v953_v0  ;;  %961 = vmatpush.bf16.msra.mxu3 %v953_v0  ;;  %s855_s16 = sshll.u32 %s1394_s15, 2  ;;  %v955_v11 = vld [vmem:[%s1382_s3 + $0x8] sm:$0xff]  ;;  %v954_v12 = vld [vmem:[%s1382_s3] sm:$0xff]  ;;  %vm601_vm2 = vcmask 261120  }
  0x15   : > { %s277_s19 = scalar_lea.vmem %s1379_s0, %s855_s16  ;;  %512 = vmatpush.bf16.msra.mxu1 %v957_v8  ;;  %v1260_v14 = vld [vmem:[%s1381_s2] ss:$0 sm:$0xff]  ;;  %s783_s16 = scalar_lea.hbm %s1386_s7, %s960_s13 }
  0x16   : > { %v945_v1 = vld [vmem:[%s277_s19] sm:$0xff]  ;;  %v946_v2 = vld [vmem:[%s277_s19 + $0x8] sm:$0xff]  ;;  %v947_v3 = vld [vmem:[%s277_s19 + $0x10] sm:$0xff]  ;;  %s786_s18 = sshll.u32 %s783_s16, 4  ;;  %s787_s18 = int_to_ptr.hbm [resolvable:$true] %s786_s18 }
  0x17   : > { %892 = vmatmul.msk.bf16.vlgmr.msra.gmra.mxu0 %vm349_vm0, %v945_v1  ;;  %v948_v4 = vld [vmem:[%s277_s19 + $0x18] sm:$0xff]  ;;  %v949_v5 = vld [vmem:[%s277_s19 + $0x20] sm:$0xff]  ;;  %v950_v7 = vld [vmem:[%s277_s19 + $0x28] sm:$0xff]  ;;  %s1090_s20 = sshra.s32 %s787_s18, 4  ;;  %s1091_s20 = int_to_ptr.hbm [resolvable:$true] %s1090_s20 }
  0x18   : > { %v952_v6 = vld [vmem:[%s277_s19 + $0x38] sm:$0xff]  ;;  %v951_v9 = vld [vmem:[%s277_s19 + $0x30] sm:$0xff]  ;;  %962 = vmatpush.bf16.msrb.mxu3 %v957_v8  ;;  %v959_v1 = vld [vmem:[%s1384_s5 + $0x8] sm:$0xff]  ;;  %s772_s19 = scalar_lea.sflag [#allocation3], %s270_s29  ;;  %s1092_s28 = scalar_lea.hbm %s1091_s20, 128 }
  0x19   : > { %899 = vmatmul.msk.bf16.vlgmr.msra.gmra.mxu3 %vm349_vm0, %v952_v6  ;;  %513 = vmatpush.bf16.msra.mxu1 %v956_v10  ;;  %p1093_p11 = scmp.ne.s32.totalorder %s1091_s20, %s1092_s28  ;;  %p1097_p0 = scmp.lt.s32.totalorder %s1091_s20, %s1386_s7 }
  0x1a   : > { %632 = vmatpush.bf16.msra.mxu2 %v959_v1  ;;  %p1098_p1 = scmp.lt.s32.totalorder %s1096_s23, %s1092_s28 }
  0x1b   : > { %p1094_p12 = pnand %p1093_p11, %p1220_p5 }
  0x1c   : > { %963 = vmatpush.bf16.msrb.mxu3 %v956_v10  ;;  %p1099_p2 = por %p1098_p1, %p1097_p0 }
  0x1d   : > { %514 = vmatpush.bf16.msra.mxu1 %v955_v11  ;;  %p1095_p13 = pneg %p1094_p12 }
  0x1f   : > { %p1100_p3 = pnand %p1099_p2, %p1095_p13 }
  0x20   : > { %964 = vmatpush.bf16.msrb.mxu3 %v955_v11 }
  0x21   : > { %515 = vmatpush.bf16.msra.mxu1 %v954_v12 }
  0x24   : > { %965 = vmatpush.bf16.msrb.mxu3 %v954_v12 }
  0x27   : > { %893 = vmatmul.msk.bf16.gmra.mxu0 %vm349_vm0, %v946_v2 }
  0x28   : > { %966 = vmatpush.bf16.msra.mxu3 %v959_v1  ;;  %v1306_v1 = vld [vmem:[%s1385_s6] ss:$0 sm:$0xff] }
  0x37   : > { %894 = vmatmul.msk.bf16.gmra.mxu0 %vm349_vm0, %v947_v3 }
  0x47   : > { %895 = vmatmul.msk.bf16.gmra.mxu0 %vm349_vm0, %v948_v4  ;;  %v958_v4 = vld [vmem:[%s1384_s5] sm:$0xff] }
  0x48   : > { %633 = vmatpush.bf16.msra.mxu2 %v958_v4  ;;  %967 = vmatpush.bf16.msra.mxu3 %v958_v4 }
  0x57   : > { %896 = vmatmul.msk.bf16.gmra.mxu0 %vm349_vm0, %v949_v5 }
  0x67   : > { %897 = vmatmul.msk.bf16.gmra.mxu0 %vm349_vm0, %v950_v7 }
  0x77   : > { %898 = vmatmul.msk.bf16.gmra.mxu0 %vm349_vm0, %v951_v9  ;;  %v1010_v9 = vld [vmem:[%s1383_s4] ss:$0 sm:$0xff] }
  0x94   : > { %v383_v13 = vpop.f32.mrf.mxu0 }
  0x95   : > { %v384_v15 = vadd.f32 %v1260_v14, %v383_v13 }
  0x97   : > { %v423_v18 = vmax.f32 %v384_v15, 0.0 }
  0x9c   : > { %v385_v16 = vpop.f32.mrf.mxu0  ;;  %v418_v59 = vpop.f32.mrf.mxu3 }
  0x9d   : > { %v386_v17 = vadd.f32 %v1260_v14, %v385_v16  ;;  %v419_v2 = vadd.f32 %v1260_v14, %v418_v59 }
  0x9f   : > { %v424_v19 = vmax.f32 %v386_v17, 0.0  ;;  %v437_v5 = vmax.f32 %v419_v2, 0.0 }
  0xa1   : > { %v439_v20 = vpack.c.bf16 %v424_v19, %v423_v18 }
  0xa3   : > { %916 = vmatmul.msk.bf16.vlgmr.msra.gmra.mxu1 %vm483_vm1, %v439_v20 }
  0xa4   : > { %v388_v21 = vpop.f32.mrf.mxu0  ;;  %v420_v0 = vpop.f32.mrf.mxu3 }
  0xa5   : > { %v389_v22 = vadd.f32 %v1260_v14, %v388_v21  ;;  %v421_v3 = vadd.f32 %v1260_v14, %v420_v0 }
  0xa7   : > { %v425_v25 = vmax.f32 %v389_v22, 0.0  ;;  %v438_v6 = vmax.f32 %v421_v3, 0.0 }
  0xa9   : > { %v446_v7 = vpack.c.bf16 %v438_v6, %v437_v5 }
  0xac   : > { %v390_v23 = vpop.f32.mrf.mxu0 }
  0xad   : > { %v391_v24 = vadd.f32 %v1260_v14, %v390_v23 }
  0xaf   : > { %v426_v26 = vmax.f32 %v391_v24, 0.0 }
  0xb1   : > { %v440_v27 = vpack.c.bf16 %v426_v26, %v425_v25 }
  0xb3   : > { %917 = vmatmul.msk.bf16.gmra.mxu1 %vm483_vm1, %v440_v27 }
  0xb4   : > { %v393_v28 = vpop.f32.mrf.mxu0 }
  0xb5   : > { %v394_v29 = vadd.f32 %v1260_v14, %v393_v28 }
  0xb7   : > { %v427_v32 = vmax.f32 %v394_v29, 0.0 }
  0xbc   : > { %v395_v30 = vpop.f32.mrf.mxu0 }
  0xbd   : > { %v396_v31 = vadd.f32 %v1260_v14, %v395_v30 }
  0xbf   : > { %v428_v33 = vmax.f32 %v396_v31, 0.0 }
  0xc1   : > { %v441_v34 = vpack.c.bf16 %v428_v33, %v427_v32 }
  0xc3   : > { %918 = vmatmul.msk.bf16.gmra.mxu1 %vm483_vm1, %v441_v34 }
  0xc4   : > { %v398_v35 = vpop.f32.mrf.mxu0 }
  0xc5   : > { %v399_v36 = vadd.f32 %v1260_v14, %v398_v35 }
  0xc7   : > { %v429_v39 = vmax.f32 %v399_v36, 0.0 }
  0xcc   : > { %v400_v37 = vpop.f32.mrf.mxu0 }
  0xcd   : > { %v401_v38 = vadd.f32 %v1260_v14, %v400_v37 }
  0xcf   : > { %v430_v40 = vmax.f32 %v401_v38, 0.0 }
  0xd1   : > { %v442_v41 = vpack.c.bf16 %v430_v40, %v429_v39 }
  0xd3   : > { %919 = vmatmul.msk.bf16.gmra.mxu1 %vm483_vm1, %v442_v41 }
  0xd4   : > { %v403_v42 = vpop.f32.mrf.mxu0 }
  0xd5   : > { %v404_v43 = vadd.f32 %v1260_v14, %v403_v42 }
  0xd7   : > { %v431_v46 = vmax.f32 %v404_v43, 0.0 }
  0xdc   : > { %v405_v44 = vpop.f32.mrf.mxu0 }
  0xdd   : > { %v406_v45 = vadd.f32 %v1260_v14, %v405_v44 }
  0xdf   : > { %v432_v47 = vmax.f32 %v406_v45, 0.0 }
  0xe1   : > { %v443_v48 = vpack.c.bf16 %v432_v47, %v431_v46 }
  0xe3   : > { %920 = vmatmul.msk.bf16.gmra.mxu1 %vm483_vm1, %v443_v48 }
  0xe4   : > { %v408_v49 = vpop.f32.mrf.mxu0 }
  0xe5   : > { %v409_v50 = vadd.f32 %v1260_v14, %v408_v49 }
  0xe7   : > { %v433_v53 = vmax.f32 %v409_v50, 0.0 }
  0xec   : > { %v410_v51 = vpop.f32.mrf.mxu0 }
  0xed   : > { %v411_v52 = vadd.f32 %v1260_v14, %v410_v51 }
  0xef   : > { %v434_v54 = vmax.f32 %v411_v52, 0.0 }
  0xf1   : > { %v444_v55 = vpack.c.bf16 %v434_v54, %v433_v53 }
  0xf3   : > { %921 = vmatmul.msk.bf16.gmra.mxu1 %vm483_vm1, %v444_v55 }
  0xf4   : > { %v413_v56 = vpop.f32.mrf.mxu0 }
  0xf5   : > { %v414_v57 = vadd.f32 %v1260_v14, %v413_v56 }
  0xf7   : > { %v435_v61 = vmax.f32 %v414_v57, 0.0 }
  0xfc   : > { %v415_v58 = vpop.f32.mrf.mxu0 }
  0xfd   : > { %v416_v60 = vadd.f32 %v1260_v14, %v415_v58 }
  0xff   : > { %v436_v62 = vmax.f32 %v416_v60, 0.0 }
 0x101   : > { %v445_v63 = vpack.c.bf16 %v436_v62, %v435_v61 }
 0x103   : > { %922 = vmatmul.msk.bf16.vlgmr.msrb.gmra.mxu3 %vm483_vm1, %v445_v63 }
 0x113   : > { %923 = vmatmul.msk.bf16.gmra.mxu3 %vm483_vm1, %v446_v7 }
 0x120   : > { %v517_v8 = vpop.f32.mrf.mxu1 }
 0x121   : > { %v518_v10 = vadd.f32 %v1010_v9, %v517_v8 }
 0x123   : > { %v557_v13 = vmax.f32 %v518_v10, 0.0 }
 0x128   : > { %v519_v11 = vpop.f32.mrf.mxu1 }
 0x129   : > { %v520_v12 = vadd.f32 %v1010_v9, %v519_v11 }
 0x12b   : > { %v558_v14 = vmax.f32 %v520_v12, 0.0 }
 0x12d   : > { %v573_v15 = vpack.c.bf16 %v558_v14, %v557_v13 }
 0x12f   : > { %932 = vmatmul.msk.bf16.vlgmr.msra.gmra.mxu2 %vm601_vm2, %v573_v15 }
 0x130   : > { %v522_v16 = vpop.f32.mrf.mxu1 }
 0x131   : > { %v523_v17 = vadd.f32 %v1010_v9, %v522_v16 }
 0x133   : > { %v559_v20 = vmax.f32 %v523_v17, 0.0 }
 0x138   : > { %v524_v18 = vpop.f32.mrf.mxu1 }
 0x139   : > { %v525_v19 = vadd.f32 %v1010_v9, %v524_v18 }
 0x13b   : > { %v560_v21 = vmax.f32 %v525_v19, 0.0 }
 0x13d   : > { %v574_v22 = vpack.c.bf16 %v560_v21, %v559_v20 }
 0x13f   : > { %933 = vmatmul.msk.bf16.gmra.mxu2 %vm601_vm2, %v574_v22 }
 0x140   : > { %v527_v23 = vpop.f32.mrf.mxu1 }
 0x141   : > { %v528_v24 = vadd.f32 %v1010_v9, %v527_v23 }
 0x143   : > { %v561_v27 = vmax.f32 %v528_v24, 0.0 }
 0x148   : > { %v529_v25 = vpop.f32.mrf.mxu1 }
 0x149   : > { %v530_v26 = vadd.f32 %v1010_v9, %v529_v25 }
 0x14b   : > { %v562_v28 = vmax.f32 %v530_v26, 0.0 }
 0x14d   : > { %v575_v29 = vpack.c.bf16 %v562_v28, %v561_v27 }
 0x14f   : > { %934 = vmatmul.msk.bf16.gmra.mxu2 %vm601_vm2, %v575_v29 }
 0x150   : > { %v532_v30 = vpop.f32.mrf.mxu1 }
 0x151   : > { %v533_v31 = vadd.f32 %v1010_v9, %v532_v30 }
 0x153   : > { %v563_v34 = vmax.f32 %v533_v31, 0.0 }
 0x158   : > { %v534_v32 = vpop.f32.mrf.mxu1 }
 0x159   : > { %v535_v33 = vadd.f32 %v1010_v9, %v534_v32 }
 0x15b   : > { %v564_v35 = vmax.f32 %v535_v33, 0.0 }
 0x15d   : > { %v576_v36 = vpack.c.bf16 %v564_v35, %v563_v34 }
 0x15f   : > { %935 = vmatmul.msk.bf16.gmra.mxu2 %vm601_vm2, %v576_v36 }
 0x160   : > { %v537_v37 = vpop.f32.mrf.mxu1 }
 0x161   : > { %v538_v38 = vadd.f32 %v1010_v9, %v537_v37 }
 0x163   : > { %v565_v41 = vmax.f32 %v538_v38, 0.0 }
 0x168   : > { %v539_v39 = vpop.f32.mrf.mxu1 }
 0x169   : > { %v540_v40 = vadd.f32 %v1010_v9, %v539_v39 }
 0x16b   : > { %v566_v42 = vmax.f32 %v540_v40, 0.0 }
 0x16d   : > { %v577_v43 = vpack.c.bf16 %v566_v42, %v565_v41 }
 0x16f   : > { %936 = vmatmul.msk.bf16.gmra.mxu2 %vm601_vm2, %v577_v43 }
 0x170   : > { %v542_v44 = vpop.f32.mrf.mxu1 }
 0x171   : > { %v543_v45 = vadd.f32 %v1010_v9, %v542_v44 }
 0x173   : > { %v567_v48 = vmax.f32 %v543_v45, 0.0 }
 0x178   : > { %v544_v46 = vpop.f32.mrf.mxu1 }
 0x179   : > { %v545_v47 = vadd.f32 %v1010_v9, %v544_v46 }
 0x17b   : > { %v568_v49 = vmax.f32 %v545_v47, 0.0 }
 0x17d   : > { %v578_v50 = vpack.c.bf16 %v568_v49, %v567_v48 }
 0x17f   : > { %937 = vmatmul.msk.bf16.gmra.mxu2 %vm601_vm2, %v578_v50 }
 0x186   : > { %v547_v51 = vpop.f32.mrf.mxu3 }
 0x187   : > { %v548_v52 = vadd.f32 %v1010_v9, %v547_v51 }
 0x189   : > { %v569_v55 = vmax.f32 %v548_v52, 0.0 }
 0x18e   : > { %v549_v53 = vpop.f32.mrf.mxu3 }
 0x18f   : > { %v550_v54 = vadd.f32 %v1010_v9, %v549_v53 }
 0x191   : > { %v570_v56 = vmax.f32 %v550_v54, 0.0 }
 0x193   : > { %v579_v57 = vpack.c.bf16 %v570_v56, %v569_v55 }
 0x195   : > { %938 = vmatmul.msk.bf16.vlgmr.msra.gmra.mxu3 %vm601_vm2, %v579_v57 }
 0x196   : > { %v552_v58 = vpop.f32.mrf.mxu3 }
 0x197   : > { %v553_v59 = vadd.f32 %v1010_v9, %v552_v58 }
 0x199   : > { %v571_v62 = vmax.f32 %v553_v59, 0.0 }
 0x19e   : > { %v554_v60 = vpop.f32.mrf.mxu3 }
 0x19f   : > { %v555_v61 = vadd.f32 %v1010_v9, %v554_v60 }
 0x1a1   : > { %v572_v63 = vmax.f32 %v555_v61, 0.0 }
 0x1a3   : > { %v580_v0 = vpack.c.bf16 %v572_v63, %v571_v62 }
 0x1a5   : > { %939 = vmatmul.msk.bf16.gmra.mxu3 %vm601_vm2, %v580_v0 }
 0x1b2   : > { %v635_v2 = vpop.f32.mrf.mxu2 }
 0x1b3   : > { %v636_v3 = vadd.f32 %v1306_v1, %v635_v2 }
 0x1b5   : > { %v675_v4 = vsub.f32 0.0, %v636_v3 }
 0x1b7   : > { %v691_v5 = vmul.f32 1.442695, %v675_v4 }
 0x1b9   : > { %1012 = vpow2.f32 %v691_v5 }
 0x1ba   : > { %v637_v6 = vpop.f32.mrf.mxu2 }
 0x1bb   : > { %v638_v7 = vadd.f32 %v1306_v1, %v637_v6 }
 0x1bd   : > { %v676_v8 = vsub.f32 0.0, %v638_v7 }
 0x1bf   : > { %v1013_v9 = vpop.eup %1012  ;;  %v693_v10 = vmul.f32 1.442695, %v676_v8 }
 0x1c0   : > { %v723_v11 = vadd.f32 1.0, %v1013_v9 }
 0x1c1   : > { %1014 = vpow2.f32 %v693_v10 }
 0x1c2   : > { %1016 = vrcp.f32 %v723_v11  ;;  %v640_v12 = vpop.f32.mrf.mxu2 }
 0x1c3   : > { %v641_v13 = vadd.f32 %v1306_v1, %v640_v12 }
 0x1c5   : > { %v677_v14 = vsub.f32 0.0, %v641_v13 }
 0x1c7   : > { %v1015_v15 = vpop.eup %1014  ;;  %v695_v16 = vmul.f32 1.442695, %v677_v14 }
 0x1c8   : > { %v1017_v17 = vpop.eup %1016  ;;  %v724_v18 = vadd.f32 1.0, %v1015_v15 }
 0x1c9   : > { %755 = vst [vmem:[%s1314_s9] sm:$0xff] %v1017_v17  ;;  %1018 = vpow2.f32 %v695_v16 }
 0x1ca   : > { %1020 = vrcp.f32 %v724_v18  ;;  %v642_v19 = vpop.f32.mrf.mxu2 }
 0x1cb   : > { %v643_v20 = vadd.f32 %v1306_v1, %v642_v19 }
 0x1cd   : > { %v678_v21 = vsub.f32 0.0, %v643_v20 }
 0x1cf   : > { %v1019_v22 = vpop.eup %1018  ;;  %v697_v23 = vmul.f32 1.442695, %v678_v21 }
 0x1d0   : > { %v1021_v24 = vpop.eup %1020  ;;  %v725_v25 = vadd.f32 1.0, %v1019_v22 }
 0x1d1   : > { %756 = vst [vmem:[%s1314_s9 + $0x8] sm:$0xff] %v1021_v24  ;;  %1022 = vpow2.f32 %v697_v23 }
 0x1d2   : > { %1024 = vrcp.f32 %v725_v25  ;;  %v645_v26 = vpop.f32.mrf.mxu2 }
 0x1d3   : > { %v646_v27 = vadd.f32 %v1306_v1, %v645_v26 }
 0x1d5   : > { %v679_v28 = vsub.f32 0.0, %v646_v27 }
 0x1d7   : > { %v1023_v29 = vpop.eup %1022  ;;  %v699_v30 = vmul.f32 1.442695, %v679_v28 }
 0x1d8   : > { %v1025_v31 = vpop.eup %1024  ;;  %v726_v32 = vadd.f32 1.0, %v1023_v29 }
 0x1d9   : > { %757 = vst [vmem:[%s1314_s9 + $0x10] sm:$0xff] %v1025_v31  ;;  %1026 = vpow2.f32 %v699_v30 }
 0x1da   : > { %1028 = vrcp.f32 %v726_v32  ;;  %v647_v33 = vpop.f32.mrf.mxu2 }
 0x1db   : > { %v648_v34 = vadd.f32 %v1306_v1, %v647_v33 }
 0x1dd   : > { %v680_v35 = vsub.f32 0.0, %v648_v34 }
 0x1df   : > { %v1027_v36 = vpop.eup %1026  ;;  %v701_v37 = vmul.f32 1.442695, %v680_v35 }
 0x1e0   : > { %v1029_v38 = vpop.eup %1028  ;;  %v727_v39 = vadd.f32 1.0, %v1027_v36 }
 0x1e1   : > { %758 = vst [vmem:[%s1314_s9 + $0x18] sm:$0xff] %v1029_v38  ;;  %1030 = vpow2.f32 %v701_v37 }
 0x1e2   : > { %1032 = vrcp.f32 %v727_v39  ;;  %v650_v40 = vpop.f32.mrf.mxu2 }
 0x1e3   : > { %v651_v41 = vadd.f32 %v1306_v1, %v650_v40 }
 0x1e5   : > { %v681_v42 = vsub.f32 0.0, %v651_v41 }
 0x1e7   : > { %v1031_v43 = vpop.eup %1030  ;;  %v703_v44 = vmul.f32 1.442695, %v681_v42 }
 0x1e8   : > { %v1033_v45 = vpop.eup %1032  ;;  %v728_v46 = vadd.f32 1.0, %v1031_v43 }
 0x1e9   : > { %759 = vst [vmem:[%s1314_s9 + $0x20] sm:$0xff] %v1033_v45  ;;  %1034 = vpow2.f32 %v703_v44 }
 0x1ea   : > { %1036 = vrcp.f32 %v728_v46  ;;  %v652_v47 = vpop.f32.mrf.mxu2 }
 0x1eb   : > { %v653_v48 = vadd.f32 %v1306_v1, %v652_v47 }
 0x1ed   : > { %v682_v49 = vsub.f32 0.0, %v653_v48 }
 0x1ef   : > { %v1035_v50 = vpop.eup %1034  ;;  %v705_v51 = vmul.f32 1.442695, %v682_v49 }
 0x1f0   : > { %v1037_v52 = vpop.eup %1036  ;;  %v729_v53 = vadd.f32 1.0, %v1035_v50 }
 0x1f1   : > { %760 = vst [vmem:[%s1314_s9 + $0x28] sm:$0xff] %v1037_v52  ;;  %1038 = vpow2.f32 %v705_v51 }
 0x1f2   : > { %1040 = vrcp.f32 %v729_v53  ;;  %v655_v54 = vpop.f32.mrf.mxu2 }
 0x1f3   : > { %v656_v55 = vadd.f32 %v1306_v1, %v655_v54 }
 0x1f5   : > { %v683_v56 = vsub.f32 0.0, %v656_v55 }
 0x1f7   : > { %v1039_v57 = vpop.eup %1038  ;;  %v707_v58 = vmul.f32 1.442695, %v683_v56 }
 0x1f8   : > { %v1041_v59 = vpop.eup %1040  ;;  %v730_v60 = vadd.f32 1.0, %v1039_v57 }
 0x1f9   : > { %761 = vst [vmem:[%s1314_s9 + $0x30] sm:$0xff] %v1041_v59  ;;  %1042 = vpow2.f32 %v707_v58 }
 0x1fa   : > { %1044 = vrcp.f32 %v730_v60  ;;  %v657_v61 = vpop.f32.mrf.mxu2 }
 0x1fb   : > { %v658_v62 = vadd.f32 %v1306_v1, %v657_v61 }
 0x1fd   : > { %v684_v63 = vsub.f32 0.0, %v658_v62 }
 0x1ff   : > { %v1043_v0 = vpop.eup %1042  ;;  %v709_v2 = vmul.f32 1.442695, %v684_v63 }
 0x200   : > { %v1045_v3 = vpop.eup %1044  ;;  %v731_v4 = vadd.f32 1.0, %v1043_v0 }
 0x201   : > { %762 = vst [vmem:[%s1314_s9 + $0x38] sm:$0xff] %v1045_v3  ;;  %1046 = vpow2.f32 %v709_v2 }
 0x202   : > { %1048 = vrcp.f32 %v731_v4  ;;  %v660_v5 = vpop.f32.mrf.mxu2 }
 0x203   : > { %v661_v6 = vadd.f32 %v1306_v1, %v660_v5 }
 0x205   : > { %v685_v7 = vsub.f32 0.0, %v661_v6 }
 0x207   : > { %v1047_v8 = vpop.eup %1046  ;;  %v711_v9 = vmul.f32 1.442695, %v685_v7 }
 0x208   : > { %v1049_v10 = vpop.eup %1048  ;;  %v732_v11 = vadd.f32 1.0, %v1047_v8 }
 0x209   : > { %763 = vst [vmem:[%s1314_s9 + $0x40] sm:$0xff] %v1049_v10  ;;  %1050 = vpow2.f32 %v711_v9 }
 0x20a   : > { %1052 = vrcp.f32 %v732_v11  ;;  %v662_v12 = vpop.f32.mrf.mxu2 }
 0x20b   : > { %v663_v13 = vadd.f32 %v1306_v1, %v662_v12 }
 0x20d   : > { %v686_v14 = vsub.f32 0.0, %v663_v13 }
 0x20f   : > { %v1051_v15 = vpop.eup %1050  ;;  %v713_v16 = vmul.f32 1.442695, %v686_v14 }
 0x210   : > { %v1053_v17 = vpop.eup %1052  ;;  %v733_v18 = vadd.f32 1.0, %v1051_v15 }
 0x211   : > { %764 = vst [vmem:[%s1314_s9 + $0x48] sm:$0xff] %v1053_v17  ;;  %1054 = vpow2.f32 %v713_v16 }
 0x212   : > { %1056 = vrcp.f32 %v733_v18 }
 0x217   : > { %v1055_v19 = vpop.eup %1054 }
 0x218   : > { %v1057_v20 = vpop.eup %1056  ;;  %v734_v21 = vadd.f32 1.0, %v1055_v19  ;;  %v665_v22 = vpop.f32.mrf.mxu3 }
 0x219   : > { %765 = vst [vmem:[%s1314_s9 + $0x50] sm:$0xff] %v1057_v20  ;;  %v666_v23 = vadd.f32 %v1306_v1, %v665_v22 }
 0x21a   : > { %1058 = vrcp.f32 %v734_v21 }
 0x21b   : > { %v687_v24 = vsub.f32 0.0, %v666_v23 }
 0x21d   : > { %v715_v25 = vmul.f32 1.442695, %v687_v24 }
 0x21f   : > { %1060 = vpow2.f32 %v715_v25 }
 0x220   : > { %v1059_v26 = vpop.eup %1058  ;;  %v667_v27 = vpop.f32.mrf.mxu3 }
 0x221   : > { %766 = vst [vmem:[%s1314_s9 + $0x58] sm:$0xff] %v1059_v26  ;;  %v668_v28 = vadd.f32 %v1306_v1, %v667_v27 }
 0x223   : > { %v688_v29 = vsub.f32 0.0, %v668_v28 }
 0x225   : > { %v1061_v30 = vpop.eup %1060  ;;  %v717_v31 = vmul.f32 1.442695, %v688_v29 }
 0x226   : > { %v735_v32 = vadd.f32 1.0, %v1061_v30 }
 0x227   : > { %1062 = vpow2.f32 %v717_v31 }
 0x228   : > { %1064 = vrcp.f32 %v735_v32  ;;  %v670_v33 = vpop.f32.mrf.mxu3 }
 0x229   : > { %v671_v34 = vadd.f32 %v1306_v1, %v670_v33 }
 0x22b   : > { %v689_v35 = vsub.f32 0.0, %v671_v34 }
 0x22d   : > { %v1063_v36 = vpop.eup %1062  ;;  %v719_v37 = vmul.f32 1.442695, %v689_v35 }
 0x22e   : > { %v1065_v38 = vpop.eup %1064  ;;  %v736_v39 = vadd.f32 1.0, %v1063_v36 }
 0x22f   : > { %767 = vst [vmem:[%s1314_s9 + $0x60] sm:$0xff] %v1065_v38  ;;  %1066 = vpow2.f32 %v719_v37 }
 0x230   : > { %1068 = vrcp.f32 %v736_v39  ;;  %v672_v40 = vpop.f32.mrf.mxu3 }
 0x231   : > { %v673_v41 = vadd.f32 %v1306_v1, %v672_v40 }
 0x233   : > { %v690_v42 = vsub.f32 0.0, %v673_v41 }
 0x235   : > { %v1067_v43 = vpop.eup %1066  ;;  %v721_v44 = vmul.f32 1.442695, %v690_v42 }
 0x236   : > { %v1069_v45 = vpop.eup %1068  ;;  %v737_v46 = vadd.f32 1.0, %v1067_v43 }
 0x237   : > { %768 = vst [vmem:[%s1314_s9 + $0x68] sm:$0xff] %v1069_v45  ;;  %1070 = vpow2.f32 %v721_v44 }
 0x238   : > { %1072 = vrcp.f32 %v737_v46 }
 0x23d   : > { %v1071_v47 = vpop.eup %1070 }
 0x23e   : > { %v1073_v48 = vpop.eup %1072  ;;  %v738_v49 = vadd.f32 1.0, %v1071_v47 }
 0x23f   : > { %769 = vst [vmem:[%s1314_s9 + $0x70] sm:$0xff] %v1073_v48 }
 0x240   : > { %1074 = vrcp.f32 %v738_v49 }
 0x246   : > { %v1075_v1 = vpop.eup %1074 }
 0x247   : > { %770 = vst [vmem:[%s1314_s9 + $0x78] sm:$0xff] %v1075_v1 }
 0x248   : > { %1103 = shalt.err (!%p1100_p3)
}
 0x249   : > { %s1140_s29 = smov 128   ;;  %s1141_s9 = smov 8  }
 0x24a   : > { %968 = dma.vmem_to_hbm [thread:$0]  (%p1220_p5), %s785_s17, 2048, %s787_s18, %s772_s19, %s1140_s29, %s1140_s29, %s1141_s9  }
 0x24b PF: > { %p974_p4 = scmp.ge.s32.totalorder %s1138_s27, 2  ;;  %s801_s14 = sand.u32 1, %s1126_s24  }
 0x24c   : > { %s802_s15 = scalar_lea.sflag [#allocation3], %s801_s14 }
 0x24d   : > { %p971_p7 = pnand %p974_p4, %p1224_p6 }
 0x24f   : > { %p972_p8 = pneg %p971_p7 }
 0x251   : > { %1121 = dma.done.wait (%p972_p8), %s802_s15, 2048  }
 0x252   : > { %1123 = vsyncadd (%p972_p8), %s802_s15, 4294965248  ;;  %p17_p9 = scmp.ge.s32.totalorder %s1207_s30, 4   ;;  %s1389_s24 = smov %s1130_s25 }
 0x253   : > { %s1390_s25 = smov %s1134_s26  ;;  %s1391_s26 = smov %s1218_s10 }
 0x254   : > { %s1392_s27 = smov %s1207_s30  ;;  %19 = sbr.rel (!%p17_p9) target bundleno = 3 (0x3), region = 83 }
 0x259   :  { %808 = vsyncpa [#allocation3], 1 }
 0x25a   :  { %810 = vsyncpa [#allocation3 + $0x1], 1 }

</bundles_post_ra>
